<compile_context>
chip_gen: v6e
topology: v6e:2x2x1
jax: 0.10.0
libtpu: 0.0.40
codegen_flags: <defaults>
</compile_context>

<pallas_src>
import functools

import jax
import jax.numpy as jnp
import numpy as np
from jax import lax
from jax.experimental import pallas as pl
from jax.experimental.pallas import tpu as pltpu

NUM_CLASSES = 4
IGNORE_LB = 255
ENET_C = 1.02
LANES = 128                  # vreg lane width
ROWS_TARGET_CE = 1024        # ~128K pixels / CE tile (f32 logits tile ~2 MiB)
ROWS_TARGET_CNT = 4096       # ~512K pixels / count tile (~2 MiB of labels)
COUNT_PAD_CLASSES = 8        # pad class axis to a full sublane -> unmasked vreg store
NCORES = 2                   # leading "parallel" axis -> both TensorCores on v7x
VMEM_LIMIT = 32 * 1024 * 1024


def _count_kernel(labels_ref, cnt_ref, *, num_classes, rows_all, r_cnt, nb_per_core):
    """Per-core partial class counts (lane-resolved, padded to 8 classes)."""
    j = pl.program_id(0)          # core / partial index     ("parallel")
    i = pl.program_id(1)          # row-block within core    ("arbitrary")

    @pl.when(i == 0)
    def _():
        cnt_ref[...] = jnp.zeros_like(cnt_ref)

    lab = labels_ref[...]                                          # (r_cnt, 128) int32
    # Mask rows outside the real array (cdiv grid last block / clamped overshoot block).
    gblk = j * nb_per_core + i
    row = gblk * r_cnt + lax.broadcasted_iota(jnp.int32, lab.shape, 0)
    lab = jnp.where(row < rows_all, lab, -1)

    # Per-lane counts accumulate in f32: exact up to ~16.7M pixels per lane
    # (~2.1G pixels total) -- plenty for realistic batches.
    rows = [jnp.sum((lab == k).astype(jnp.float32), axis=0, keepdims=True)
            for k in range(num_classes)]
    if COUNT_PAD_CLASSES > num_classes:
        rows.append(jnp.zeros((COUNT_PAD_CLASSES - num_classes, lab.shape[1]),
                              jnp.float32))
    # One full-block add + unmasked store per tile (no per-class masked RMWs).
    cnt_ref[...] = cnt_ref[...] + jnp.concatenate(rows, axis=0)


def _weighted_ce_kernel(w_ref, logits_ref, labels_ref, loss_ref, *, num_classes):
    """Per-pixel weighted cross-entropy.  w_ref is a (C,) SMEM scalar array."""
    x = logits_ref[...].astype(jnp.float32)                        # (C, R, 128)
    lab = labels_ref[...]                                          # (R, 128) int32

    m = jnp.max(x, axis=0)                                         # (R, 128)
    lse = m + jnp.log(jnp.sum(jnp.exp(x - m[None]), axis=0))       # (R, 128)

    logit_y = jnp.zeros_like(lse)
    w_y = jnp.zeros_like(lse)
    for k in range(num_classes):
        sel = lab == k
        logit_y = jnp.where(sel, x[k], logit_y)
        w_y = jnp.where(sel, w_ref[k], w_y)                        # scalar splat

    # Ignored (label == ignore_lb >= num_classes) and OOB-pad pixels match no
    # class, so w_y == 0 and the product is exactly 0 (lse is finite): no
    # explicit ignore mask needed.  Keep this invariant if the loop changes.
    loss_ref[...] = w_y * (lse - logit_y)


def weighted_ohem_ce_loss(logits_nchw, labels_nhw, *, thresh, n_min,
                          ignore_lb=IGNORE_LB):
    n, c, h, w = logits_nchw.shape
    hw = h * w
    p = n * hw
    assert hw % LANES == 0, "H*W must be a multiple of 128 (vreg lane width)"
    assert 0 <= n_min < p
    assert c <= COUNT_PAD_CLASSES
    assert ignore_lb < 0 or ignore_lb >= c, "ignore label must lie outside [0, C)"

    rows_img = hw // LANES         # sublane rows per image
    rows_all = p // LANES          # sublane rows total

    # Pure reshapes (pixels stay sublane/lane-dense).  Logits keep their native
    # dtype through the DMA; the kernel widens to f32.
    logits = logits_nchw.reshape(n, c, rows_img, LANES)
    labels_img = labels_nhw.reshape(n, rows_img, LANES).astype(jnp.int32)
    labels_flat = labels_nhw.reshape(rows_all, LANES).astype(jnp.int32)

    # --- Kernel 1: label bincount (per-core partials); ENet weights in glue ---
    r_cnt = rows_all if rows_all <= ROWS_TARGET_CNT else ROWS_TARGET_CNT
    nb = pl.cdiv(rows_all, r_cnt)
    nb_per_core = pl.cdiv(nb, NCORES)

    partial_counts = pl.pallas_call(
        functools.partial(_count_kernel, num_classes=c, rows_all=rows_all,
                          r_cnt=r_cnt, nb_per_core=nb_per_core),
        out_shape=jax.ShapeDtypeStruct((NCORES, COUNT_PAD_CLASSES, LANES),
                                       jnp.float32),
        grid=(NCORES, nb_per_core),
        in_specs=[pl.BlockSpec(
            (r_cnt, LANES),
            lambda j, i: (jnp.minimum(j * nb_per_core + i, nb - 1), 0))],
        out_specs=pl.BlockSpec((None, COUNT_PAD_CLASSES, LANES),
                               lambda j, i: (j, 0, 0)),
        compiler_params=pltpu.CompilerParams(
            dimension_semantics=("parallel", "arbitrary"),
            vmem_limit_bytes=VMEM_LIMIT),
    )(labels_flat)

    # Finalize ENet weights (C scalars) in JAX glue.  Counts exclude labels
    # outside [0, C) (e.g. ignore=255) but divide by the full pixel count,
    # matching the reference semantics.
    counts = jnp.sum(partial_counts, axis=(0, 2))[:c]              # (C,)
    weights = (1.0 / jnp.log(ENET_C + counts / p)).astype(jnp.float32)

    # --- Kernel 2: per-pixel weighted cross-entropy ---
    r_ce = rows_img if rows_img <= ROWS_TARGET_CE else ROWS_TARGET_CE
    loss = pl.pallas_call(
        functools.partial(_weighted_ce_kernel, num_classes=c),
        out_shape=jax.ShapeDtypeStruct((n, rows_img, LANES), jnp.float32),
        grid=(n, pl.cdiv(rows_img, r_ce)),
        in_specs=[
            pl.BlockSpec(memory_space=pltpu.MemorySpace.SMEM),     # (C,) weights
            pl.BlockSpec((None, c, r_ce, LANES), lambda b, r: (b, 0, r, 0)),
            pl.BlockSpec((None, r_ce, LANES), lambda b, r: (b, r, 0)),
        ],
        out_specs=pl.BlockSpec((None, r_ce, LANES), lambda b, r: (b, r, 0)),
        compiler_params=pltpu.CompilerParams(
            dimension_semantics=("parallel", "parallel"),
            vmem_limit_bytes=VMEM_LIMIT),
    )(weights, logits, labels_img)

    # --- OHEM selection glue ---
    loss_flat = loss.reshape(-1)
    thresh_val = -jnp.log(jnp.float32(thresh))

    above = loss_flat > thresh_val
    count_above = jnp.sum(above.astype(jnp.int32))
    sum_above = jnp.sum(jnp.where(above, loss_flat, 0.0))

    # `sorted_desc[n_min] > thresh`  <=>  `count(loss > thresh) > n_min`.
    def _mean_above(_):
        return sum_above / count_above.astype(jnp.float32)

    def _mean_topk(_):
        # TODO(synk): descending sort / top-k selection has no clean Pallas TPU
        # lowering; it stays in XLA and only runs on this (rare) branch.
        topk, _ = lax.top_k(loss_flat, n_min)
        return jnp.mean(topk)

    return lax.cond(count_above > n_min, _mean_above, _mean_topk, 0)


def _reference(logits, labels, *, thresh, n_min, num_classes, ignore_lb):
    """Pure-JAX re-implementation of the PyTorch forward, for checking."""
    n, c, h, w = logits.shape
    flat = labels.reshape(-1).astype(jnp.int32)
    counts = jnp.zeros((num_classes,), jnp.float32).at[flat].add(1.0)
    wts = 1.0 / jnp.log(ENET_C + counts / flat.size)
    lg = jnp.transpose(logits, (0, 2, 3, 1)).reshape(-1, c)
    logp = jax.nn.log_softmax(lg.astype(jnp.float32), axis=-1)
    per = -jnp.take_along_axis(logp, flat[:, None], axis=-1)[:, 0] * wts[flat]
    per = jnp.where(flat == ignore_lb, 0.0, per)
    thresh_val = -jnp.log(jnp.float32(thresh))
    s = jnp.sort(per)[::-1]
    kth = s[n_min]
    above = s > thresh_val
    mean_above = jnp.sum(jnp.where(above, s, 0.0)) / jnp.sum(above.astype(jnp.float32))
    mean_topk = jnp.mean(s[:n_min])
    return jnp.where(kth > thresh_val, mean_above, mean_topk)


if __name__ == "__main__":
    key = jax.random.PRNGKey(0)
    k1, k2 = jax.random.split(key)

    N, C, H, W = 2, NUM_CLASSES, 16, 16
    thresh = 0.7
    n_min = 64  # module hyper-parameters set deterministically in-script

    logits = jax.random.normal(k1, (N, C, H, W), dtype=jnp.float32)
    # labels kept inside [0, num_classes): the reference enet_weighing would
    # otherwise produce a weight vector longer than num_classes and crash.
    labels = jax.random.randint(k2, (N, H, W), 0, NUM_CLASSES, dtype=jnp.int32)

    loss_fn = jax.jit(functools.partial(weighted_ohem_ce_loss,
                                        thresh=thresh, n_min=n_min))
    out = jax.block_until_ready(loss_fn(logits, labels))

    ref = _reference(logits, labels, thresh=thresh, n_min=n_min,
                     num_classes=NUM_CLASSES, ignore_lb=IGNORE_LB)
    ref = jax.block_until_ready(ref)

    assert np.allclose(np.asarray(out), np.asarray(ref), rtol=1e-4, atol=1e-4), (
        out, ref)
    print("KERNEL_OK")
</pallas_src>

<mosaic_0001>
module attributes {stable_mosaic.version = 11 : i64} {
  func.func @_count_kernel(%arg0: i32, %arg1: i32, %arg2: memref<4x128xi32, #tpu.memory_space<vmem>>, %arg3: memref<1x8x128xf32, #tpu.memory_space<vmem>>) attributes {dimension_semantics = [#tpu.dimension_semantics<parallel>, #tpu.dimension_semantics<arbitrary>], iteration_bounds = array<i64: 2, 1>, scalar_prefetch = 0 : i64, scratch_operands = 0 : i64, tpu.core_type = #tpu.core_type<tc>, window_params = [{transform_indices = @transform_0, window_bounds = array<i64: 4, 128>}, {transform_indices = @transform_1, window_bounds = array<i64: 1, 8, 128>}]} {
    %c0_i32 = arith.constant 0 : i32
    %0 = arith.cmpi eq, %arg1, %c0_i32 : i32
    %1 = arith.extui %0 : i1 to i32
    %c0_i32_0 = arith.constant 0 : i32
    %2 = arith.cmpi ne, %1, %c0_i32_0 : i32
    scf.if %2 {
      %cst_15 = arith.constant 0.000000e+00 : f32
      %46 = vector.broadcast %cst_15 : f32 to vector<8x128xf32>
      %c0_16 = arith.constant 0 : index
      %c0_17 = arith.constant 0 : index
      %c0_18 = arith.constant 0 : index
      %47 = vector.load %arg3[%c0_16, %c0_17, %c0_18] : memref<1x8x128xf32, #tpu.memory_space<vmem>>, vector<1x8x128xf32>
      %48 = vector.shape_cast %47 : vector<1x8x128xf32> to vector<8x128xf32>
      %49 = vector.shape_cast %46 : vector<8x128xf32> to vector<1x8x128xf32>
      tpu.vector_store %arg3[%c0_16, %c0_17, %c0_18], %49 {strides = array<i32>} : memref<1x8x128xf32, #tpu.memory_space<vmem>>, vector<1x8x128xf32>,
    } else {
    }
    %c0 = arith.constant 0 : index
    %c0_1 = arith.constant 0 : index
    %3 = vector.load %arg2[%c0, %c0_1] : memref<4x128xi32, #tpu.memory_space<vmem>>, vector<4x128xi32>
    %c1_i32 = arith.constant 1 : i32
    %4 = arith.muli %arg0, %c1_i32 : i32
    %5 = arith.addi %4, %arg1 : i32
    %c4_i32 = arith.constant 4 : i32
    %6 = arith.muli %5, %c4_i32 : i32
    %7 = tpu.iota {dimensions = array<i32: 0>} : vector<4x128xi32>
    %8 = vector.broadcast %6 : i32 to vector<4x128xi32>
    %9 = arith.addi %8, %7 : vector<4x128xi32>
    %c4_i32_2 = arith.constant 4 : i32
    %10 = vector.broadcast %c4_i32_2 : i32 to vector<4x128xi32>
    %11 = arith.cmpi slt, %9, %10 : vector<4x128xi32>
    %c-1_i32 = arith.constant -1 : i32
    %12 = vector.broadcast %c-1_i32 : i32 to vector<4x128xi32>
    %13 = arith.select %11, %3, %12 : vector<4x128xi1>, vector<4x128xi32>
    %c0_i32_3 = arith.constant 0 : i32
    %14 = vector.broadcast %c0_i32_3 : i32 to vector<4x128xi32>
    %15 = arith.cmpi eq, %13, %14 : vector<4x128xi32>
    %16 = arith.extui %15 : vector<4x128xi1> to vector<4x128xi32>
    %17 = arith.sitofp %16 : vector<4x128xi32> to vector<4x128xf32>
    %cst = arith.constant dense<0.000000e+00> : vector<128xf32>
    %18 = vector.multi_reduction <add>, %17, %cst [0] : vector<4x128xf32> to vector<128xf32>
    %19 = vector.shape_cast %18 : vector<128xf32> to vector<1x128xf32>
    %c1_i32_4 = arith.constant 1 : i32
    %20 = vector.broadcast %c1_i32_4 : i32 to vector<4x128xi32>
    %21 = arith.cmpi eq, %13, %20 : vector<4x128xi32>
    %22 = arith.extui %21 : vector<4x128xi1> to vector<4x128xi32>
    %23 = arith.sitofp %22 : vector<4x128xi32> to vector<4x128xf32>
    %cst_5 = arith.constant dense<0.000000e+00> : vector<128xf32>
    %24 = vector.multi_reduction <add>, %23, %cst_5 [0] : vector<4x128xf32> to vector<128xf32>
    %25 = vector.shape_cast %24 : vector<128xf32> to vector<1x128xf32>
    %c2_i32 = arith.constant 2 : i32
    %26 = vector.broadcast %c2_i32 : i32 to vector<4x128xi32>
    %27 = arith.cmpi eq, %13, %26 : vector<4x128xi32>
    %28 = arith.extui %27 : vector<4x128xi1> to vector<4x128xi32>
    %29 = arith.sitofp %28 : vector<4x128xi32> to vector<4x128xf32>
    %cst_6 = arith.constant dense<0.000000e+00> : vector<128xf32>
    %30 = vector.multi_reduction <add>, %29, %cst_6 [0] : vector<4x128xf32> to vector<128xf32>
    %31 = vector.shape_cast %30 : vector<128xf32> to vector<1x128xf32>
    %c3_i32 = arith.constant 3 : i32
    %32 = vector.broadcast %c3_i32 : i32 to vector<4x128xi32>
    %33 = arith.cmpi eq, %13, %32 : vector<4x128xi32>
    %34 = arith.extui %33 : vector<4x128xi1> to vector<4x128xi32>
    %35 = arith.sitofp %34 : vector<4x128xi32> to vector<4x128xf32>
    %cst_7 = arith.constant dense<0.000000e+00> : vector<128xf32>
    %36 = vector.multi_reduction <add>, %35, %cst_7 [0] : vector<4x128xf32> to vector<128xf32>
    %37 = vector.shape_cast %36 : vector<128xf32> to vector<1x128xf32>
    %cst_8 = arith.constant 0.000000e+00 : f32
    %38 = vector.broadcast %cst_8 : f32 to vector<4x128xf32>
    %c0_9 = arith.constant 0 : index
    %c0_10 = arith.constant 0 : index
    %c0_11 = arith.constant 0 : index
    %39 = vector.load %arg3[%c0_9, %c0_10, %c0_11] : memref<1x8x128xf32, #tpu.memory_space<vmem>>, vector<1x8x128xf32>
    %40 = vector.shape_cast %39 : vector<1x8x128xf32> to vector<8x128xf32>
    %41 = tpu.concatenate %19, %25, %31, %37, %38 in 0 : vector<1x128xf32>, vector<1x128xf32>, vector<1x128xf32>, vector<1x128xf32>, vector<4x128xf32> -> vector<8x128xf32>
    %42 = arith.addf %40, %41 : vector<8x128xf32>
    %c0_12 = arith.constant 0 : index
    %c0_13 = arith.constant 0 : index
    %c0_14 = arith.constant 0 : index
    %43 = vector.load %arg3[%c0_12, %c0_13, %c0_14] : memref<1x8x128xf32, #tpu.memory_space<vmem>>, vector<1x8x128xf32>
    %44 = vector.shape_cast %43 : vector<1x8x128xf32> to vector<8x128xf32>
    %45 = vector.shape_cast %42 : vector<8x128xf32> to vector<1x8x128xf32>
    tpu.vector_store %arg3[%c0_12, %c0_13, %c0_14], %45 {strides = array<i32>} : memref<1x8x128xf32, #tpu.memory_space<vmem>>, vector<1x8x128xf32>,
    return
  }
  func.func @transform_0(%arg0: i32, %arg1: i32) -> (i32, i32) {
    %c1_i32 = arith.constant 1 : i32
    %0 = arith.muli %arg0, %c1_i32 : i32
    %1 = arith.addi %0, %arg1 : i32
    %c0_i32 = arith.constant 0 : i32
    %2 = arith.minsi %1, %c0_i32 : i32
    %c0_i32_0 = arith.constant 0 : i32
    %c0_i32_1 = arith.constant 0 : i32
    return %2, %c0_i32_0 : i32, i32
  }
  func.func @transform_1(%arg0: i32, %arg1: i32) -> (i32, i32, i32) {
    %c0_i32 = arith.constant 0 : i32
    %c0_i32_0 = arith.constant 0 : i32
    %c0_i32_1 = arith.constant 0 : i32
    return %arg0, %c0_i32, %c0_i32_0 : i32, i32, i32
  }
}

module attributes {stable_mosaic.version = 11 : i64} {
  func.func @_weighted_ce_kernel(%arg0: i32, %arg1: i32, %arg2: memref<4xf32, #tpu.memory_space<smem>>, %arg3: memref<1x4x2x128xf32, #tpu.memory_space<vmem>>, %arg4: memref<1x2x128xi32, #tpu.memory_space<vmem>>, %arg5: memref<1x2x128xf32, #tpu.memory_space<vmem>>) attributes {dimension_semantics = [#tpu.dimension_semantics<parallel>, #tpu.dimension_semantics<parallel>], iteration_bounds = array<i64: 2, 1>, scalar_prefetch = 0 : i64, scratch_operands = 0 : i64, tpu.core_type = #tpu.core_type<tc>, window_params = [{transform_indices = @transform_0, window_bounds = array<i64: 4>}, {transform_indices = @transform_1, window_bounds = array<i64: 1, 4, 2, 128>}, {transform_indices = @transform_2, window_bounds = array<i64: 1, 2, 128>}, {transform_indices = @transform_3, window_bounds = array<i64: 1, 2, 128>}]} {
    %c0 = arith.constant 0 : index
    %c0_0 = arith.constant 0 : index
    %c0_1 = arith.constant 0 : index
    %c0_2 = arith.constant 0 : index
    %0 = vector.load %arg3[%c0, %c0_0, %c0_1, %c0_2] : memref<1x4x2x128xf32, #tpu.memory_space<vmem>>, vector<1x4x2x128xf32>
    %1 = vector.shape_cast %0 : vector<1x4x2x128xf32> to vector<4x2x128xf32>
    %c0_3 = arith.constant 0 : index
    %c0_4 = arith.constant 0 : index
    %c0_5 = arith.constant 0 : index
    %2 = vector.load %arg4[%c0_3, %c0_4, %c0_5] : memref<1x2x128xi32, #tpu.memory_space<vmem>>, vector<1x2x128xi32>
    %3 = vector.shape_cast %2 : vector<1x2x128xi32> to vector<2x128xi32>
    %cst = arith.constant dense<0xFF800000> : vector<2x128xf32>
    %4 = vector.multi_reduction <maximumf>, %1, %cst [0] : vector<4x2x128xf32> to vector<2x128xf32>
    %5 = vector.shape_cast %4 : vector<2x128xf32> to vector<1x2x128xf32>
    %6 = vector.broadcast %5 : vector<1x2x128xf32> to vector<4x2x128xf32>
    %7 = arith.subf %1, %6 : vector<4x2x128xf32>
    %8 = math.exp %7 : vector<4x2x128xf32>
    %cst_6 = arith.constant dense<0.000000e+00> : vector<2x128xf32>
    %9 = vector.multi_reduction <add>, %8, %cst_6 [0] : vector<4x2x128xf32> to vector<2x128xf32>
    %10 = math.log %9 : vector<2x128xf32>
    %11 = arith.addf %4, %10 : vector<2x128xf32>
    %cst_7 = arith.constant 0.000000e+00 : f32
    %12 = vector.broadcast %cst_7 : f32 to vector<2x128xf32>
    %cst_8 = arith.constant 0.000000e+00 : f32
    %13 = vector.broadcast %cst_8 : f32 to vector<2x128xf32>
    %c0_i32 = arith.constant 0 : i32
    %14 = vector.broadcast %c0_i32 : i32 to vector<2x128xi32>
    %15 = arith.cmpi eq, %3, %14 : vector<2x128xi32>
    %16 = vector.extract_strided_slice %1 {offsets = [0, 0, 0], sizes = [1, 2, 128], strides = [1, 1, 1]} : vector<4x2x128xf32> to vector<1x2x128xf32>
    %17 = vector.shape_cast %16 : vector<1x2x128xf32> to vector<2x128xf32>
    %18 = arith.select %15, %17, %12 : vector<2x128xi1>, vector<2x128xf32>
    %c0_9 = arith.constant 0 : index
    %19 = memref.load %arg2[%c0_9] : memref<4xf32, #tpu.memory_space<smem>>
    %20 = vector.broadcast %19 : f32 to vector<2x128xf32>
    %21 = arith.select %15, %20, %13 : vector<2x128xi1>, vector<2x128xf32>
    %c1_i32 = arith.constant 1 : i32
    %22 = vector.broadcast %c1_i32 : i32 to vector<2x128xi32>
    %23 = arith.cmpi eq, %3, %22 : vector<2x128xi32>
    %24 = vector.extract_strided_slice %1 {offsets = [1, 0, 0], sizes = [1, 2, 128], strides = [1, 1, 1]} : vector<4x2x128xf32> to vector<1x2x128xf32>
    %25 = vector.shape_cast %24 : vector<1x2x128xf32> to vector<2x128xf32>
    %26 = arith.select %23, %25, %18 : vector<2x128xi1>, vector<2x128xf32>
    %c1 = arith.constant 1 : index
    %27 = memref.load %arg2[%c1] : memref<4xf32, #tpu.memory_space<smem>>
    %28 = vector.broadcast %27 : f32 to vector<2x128xf32>
    %29 = arith.select %23, %28, %21 : vector<2x128xi1>, vector<2x128xf32>
    %c2_i32 = arith.constant 2 : i32
    %30 = vector.broadcast %c2_i32 : i32 to vector<2x128xi32>
    %31 = arith.cmpi eq, %3, %30 : vector<2x128xi32>
    %32 = vector.extract_strided_slice %1 {offsets = [2, 0, 0], sizes = [1, 2, 128], strides = [1, 1, 1]} : vector<4x2x128xf32> to vector<1x2x128xf32>
    %33 = vector.shape_cast %32 : vector<1x2x128xf32> to vector<2x128xf32>
    %34 = arith.select %31, %33, %26 : vector<2x128xi1>, vector<2x128xf32>
    %c2 = arith.constant 2 : index
    %35 = memref.load %arg2[%c2] : memref<4xf32, #tpu.memory_space<smem>>
    %36 = vector.broadcast %35 : f32 to vector<2x128xf32>
    %37 = arith.select %31, %36, %29 : vector<2x128xi1>, vector<2x128xf32>
    %c3_i32 = arith.constant 3 : i32
    %38 = vector.broadcast %c3_i32 : i32 to vector<2x128xi32>
    %39 = arith.cmpi eq, %3, %38 : vector<2x128xi32>
    %40 = vector.extract_strided_slice %1 {offsets = [3, 0, 0], sizes = [1, 2, 128], strides = [1, 1, 1]} : vector<4x2x128xf32> to vector<1x2x128xf32>
    %41 = vector.shape_cast %40 : vector<1x2x128xf32> to vector<2x128xf32>
    %42 = arith.select %39, %41, %34 : vector<2x128xi1>, vector<2x128xf32>
    %c3 = arith.constant 3 : index
    %43 = memref.load %arg2[%c3] : memref<4xf32, #tpu.memory_space<smem>>
    %44 = vector.broadcast %43 : f32 to vector<2x128xf32>
    %45 = arith.select %39, %44, %37 : vector<2x128xi1>, vector<2x128xf32>
    %46 = arith.subf %11, %42 : vector<2x128xf32>
    %47 = arith.mulf %45, %46 : vector<2x128xf32>
    %c0_10 = arith.constant 0 : index
    %c0_11 = arith.constant 0 : index
    %c0_12 = arith.constant 0 : index
    %48 = vector.load %arg5[%c0_10, %c0_11, %c0_12] : memref<1x2x128xf32, #tpu.memory_space<vmem>>, vector<1x2x128xf32>
    %49 = vector.shape_cast %48 : vector<1x2x128xf32> to vector<2x128xf32>
    %50 = vector.shape_cast %47 : vector<2x128xf32> to vector<1x2x128xf32>
    tpu.vector_store %arg5[%c0_10, %c0_11, %c0_12], %50 {strides = array<i32>} : memref<1x2x128xf32, #tpu.memory_space<vmem>>, vector<1x2x128xf32>,
    return
  }
  func.func @transform_0(%arg0: i32, %arg1: i32) -> i32 {
    %c0_i32 = arith.constant 0 : i32
    %c0_i32_0 = arith.constant 0 : i32
    return %c0_i32 : i32
  }
  func.func @transform_1(%arg0: i32, %arg1: i32) -> (i32, i32, i32, i32) {
    %c0_i32 = arith.constant 0 : i32
    %c0_i32_0 = arith.constant 0 : i32
    %c0_i32_1 = arith.constant 0 : i32
    return %arg0, %c0_i32, %arg1, %c0_i32_0 : i32, i32, i32, i32
  }
  func.func @transform_2(%arg0: i32, %arg1: i32) -> (i32, i32, i32) {
    %c0_i32 = arith.constant 0 : i32
    %c0_i32_0 = arith.constant 0 : i32
    return %arg0, %arg1, %c0_i32 : i32, i32, i32
  }
  func.func @transform_3(%arg0: i32, %arg1: i32) -> (i32, i32, i32) {
    %c0_i32 = arith.constant 0 : i32
    %c0_i32_0 = arith.constant 0 : i32
    return %arg0, %arg1, %c0_i32 : i32, i32, i32
  }
}

</mosaic_0001>

<bundles_post_ra>
// kernel: weighted_ohem_ce_loss.2
= control target key start
LH: loop header
LB: loop body
LE: loop exit
PB: predicated region body
PF: predicated region fallthrough
CT: control target
= control target key end

     0   :  { %s348_s6 = smov 0   ;;  %s350_s7 = smov 0   ;;  %s393_s0 = inlined_call_operand.vmem [shape: s32[4,128], index: 0, kind: input, shape index: {}]   ;;  %s394_s1 = inlined_call_operand.vmem [shape: f32[2,8,128], index: 1, kind: output, shape index: {}]  }
   0x1   :  { %s352_s8 = smov 0  }
   0x2 LB: > { %s23_s9 = sadd.s32 1, %s331_s7  ;;  %p275_p0 = scmp.ge.s32.totalorder %s335_s8, 1  ;;  %s335_s8 = sphi %s352_s8, %s11_s8   ;;  %s331_s7 = sphi %s350_s7, %s396_s7   ;;  %s327_s6 = sphi %s348_s6, %s395_s6  }
   0x3   : > { %p25_p1 = scmp.ge.s32.totalorder %s23_s9, 2  ;;  %p110_p2 = scmp.lt.s32.totalorder %s335_s8, 3 }
   0x5   : > { %s398_s9 = smov (%p25_p1, %s23_s9), 0  ;;  %p111_p3 = pnand %p275_p0, %p110_p2 }
   0x6   : > { %p132_p4 = scmp.lt.s32.totalorder (!%p111_p3), %s327_s6, 0  ;;  %s281_s10 = sshll.u32 (!%p111_p3), %s327_s6, 2 }
   0x7   : > { %114 = sbr.rel (%p111_p3) target bundleno = 40 (0x28), region = 24  ;;  %p141_p5 = scmp.lt.s32.totalorder (!%p111_p3), %s327_s6, 1 }
   0xc   : > { %v153_v0 = vlaneseq  ;;  %s133_s11 = scalar_select %p132_p4, %s327_s6, 0  ;;  %v155_v2 = vstv %s281_s10  ;;  %vm162_vm1 = vcmask 1043456   ;;  %v337_v6 = vmov 0.0  }
   0xd   : > { %s402_s6 = smov (!%p141_p5, %s327_s6), 1  ;;  %vm201_vm6 = vcmask 1040384   ;;  %vm203_vm7 = vcmask 1041408   ;;  %vm205_vm8 = vcmask 1042432  }
   0xe   : > { %v154_v1 = vshrl.u32 %v153_v0, 7  ;;  %s400_s11 = smov (!%p132_p4, %s133_s11), 0  ;;  %s280_s16 = sshll.u32 %s402_s6, 3 }
   0xf   : > { %s279_s12 = sshll.u32 %s400_s11, 2  ;;  %s144_s19 = scalar_lea.vmem %s394_s1, %s280_s16 }
  0x10   : > { %v156_v3 = vadd.s32 %v155_v2, %v154_v1  ;;  %s137_s15 = scalar_lea.vmem %s393_s0, %s279_s12 }
  0x11   : > { %v150_v4 = vld [vmem:[%s137_s15] sm:$0xf] }
  0x12   : > { %vm157_vm0 = vcmp.lt.s32.totalorder %v156_v3, 4 }
  0x13   : > { %v158_v5 = vsel %vm157_vm0, %v150_v4, 4294967295 }
  0x14   : > { %vm159_vm2 = vcmp.eq.s32.totalorder %v158_v5, 0  ;;  %vm170_vm3 = vcmp.eq.s32.totalorder %v158_v5, 1  ;;  %vm180_vm4 = vcmp.eq.s32.totalorder %v158_v5, 2  ;;  %vm190_vm5 = vcmp.eq.s32.totalorder %v158_v5, 3 }
  0x15   : > { %v282_v7 = vsel %vm159_vm2, 1.0, %v337_v6  ;;  %v283_v8 = vsel %vm170_vm3, 1.0, %v337_v6  ;;  %v284_v9 = vsel %vm180_vm4, 1.0, %v337_v6  ;;  %v285_v10 = vsel %vm190_vm5, 1.0, %v337_v6 }
  0x16   : > { %v163_v11 = vsel %vm162_vm1, %v282_v7, 0.0  ;;  %v173_v12 = vsel %vm162_vm1, %v283_v8, 0.0  ;;  %v183_v13 = vsel %vm162_vm1, %v284_v9, 0.0  ;;  %v193_v14 = vsel %vm162_vm1, %v285_v10, 0.0 }
  0x17   : > { %v164_v15 = vrot.slane %v163_v11, 4  ;;  %v174_v16 = vrot.slane %v173_v12, 4  ;;  %v184_v17 = vrot.slane %v183_v13, 4  ;;  %v194_v18 = vrot.slane %v193_v14, 4 }
  0x19   : > { %v165_v19 = vadd.f32 %v164_v15, %v163_v11  ;;  %v175_v20 = vadd.f32 %v174_v16, %v173_v12  ;;  %v185_v21 = vadd.f32 %v184_v17, %v183_v13  ;;  %v195_v22 = vadd.f32 %v194_v18, %v193_v14 }
  0x1b   : > { %v166_v23 = vrot.slane %v165_v19, 2  ;;  %v176_v24 = vrot.slane %v175_v20, 2  ;;  %v186_v25 = vrot.slane %v185_v21, 2  ;;  %v196_v26 = vrot.slane %v195_v22, 2 }
  0x1d   : > { %v167_v27 = vadd.f32 %v166_v23, %v165_v19  ;;  %v177_v28 = vadd.f32 %v176_v24, %v175_v20  ;;  %v187_v29 = vadd.f32 %v186_v25, %v185_v21  ;;  %v197_v30 = vadd.f32 %v196_v26, %v195_v22 }
  0x1f   : > { %v168_v31 = vrot.slane %v167_v27, 1  ;;  %v178_v32 = vrot.slane %v177_v28, 1  ;;  %v188_v33 = vrot.slane %v187_v29, 1  ;;  %v198_v34 = vrot.slane %v197_v30, 1 }
  0x21   : > { %v169_v35 = vadd.f32 %v168_v31, %v167_v27  ;;  %v179_v36 = vadd.f32 %v178_v32, %v177_v28  ;;  %v189_v37 = vadd.f32 %v188_v33, %v187_v29  ;;  %v199_v38 = vadd.f32 %v198_v34, %v197_v30 }
  0x23   : > { %v202_v39 = vsel %vm201_vm6, %v169_v35, %v179_v36 }
  0x24   : > { %v204_v40 = vsel %vm203_vm7, %v202_v39, %v189_v37 }
  0x25   : > { %v206_v41 = vsel %vm205_vm8, %v204_v40, %v199_v38 }
  0x26   : > { %v207_v42 = vsel %vm162_vm1, %v206_v41, 0.0 }
  0x27   : > { %209 = vst [vmem:[%s144_s19] sm:$0xff] %v207_v42 }
  0x28 PF: > { %s11_s8 = sadd.s32 1, %s335_s8   ;;  %s395_s6 = smov %s331_s7 }
  0x29   : > { %p8_p6 = scmp.ge.s32.totalorder %s11_s8, 4   ;;  %s396_s7 = smov %s398_s9 }
  0x2b   :  { %10 = sbr.rel (!%p8_p6) target bundleno = 2 (0x2), region = 58 }

// kernel: weighted_ohem_ce_loss.3
= control target key start
LH: loop header
LB: loop body
LE: loop exit
PB: predicated region body
PF: predicated region fallthrough
CT: control target
= control target key end

     0   :  { %8 = vsyncpa [#allocation3], 0  ;;  %s531_s12 = smov 0   ;;  %s533_s13 = smov 0   ;;  %s609_s0 = inlined_call_operand.vmem [shape: f32[4], index: 0, kind: input, shape index: {}]   ;;  %s610_s1 = inlined_call_operand.vmem [shape: f32[2,4,2,128], index: 1, kind: input, shape index: {}]   ;;  %s611_s2 = inlined_call_operand.vmem [shape: s32[2,2,128], index: 2, kind: input, shape index: {}]   ;;  %s612_s3 = inlined_call_operand.vmem [shape: f32[2,2,128], index: 3, kind: output, shape index: {}]  }
   0x1   :  { %s535_s14 = smov 0  }
   0x2 LB: > { %s405_s15 = sadd.s32 4294967295, %s508_s14   ;;  %s26_s16 = sadd.s32 1, %s504_s13  ;;  %s508_s14 = sphi %s535_s14, %s14_s14   ;;  %s504_s13 = sphi %s533_s13, %s616_s13   ;;  %s500_s12 = sphi %s531_s12, %s615_s12  }
   0x3   : > { %p28_p0 = scmp.ge.s32.totalorder %s26_s16, 2  ;;  %p407_p1 = scmp.ge.s32.totalorder %s508_s14, 1 }
   0x4   : > { %p136_p2 = scmp.lt.s32.totalorder %s508_s14, 3  ;;  %p556_p4 = scmp.eq.s32.totalorder %s405_s15, 0 }
   0x5   : > { %s618_s16 = smov (%p28_p0, %s26_s16), 0  ;;  %s149_s21 = sshll.u32 %s609_s0, 4  ;;  %s150_s21 = int_to_ptr.vmem [resolvable:$true] %s149_s21 }
   0x6   : > { %p552_p3 = pnand %p407_p1, %p136_p2  ;;  %s467_s22 = scalar_lea.vmem %s150_s21, 16 }
   0x7   : > { %p468_p7 = scmp.ne.s32.totalorder %s150_s21, %s467_s22  ;;  %p475_p11 = scmp.lt.s32.totalorder %s150_s21, %s150_s21 }
   0x8   : > { %p426_p5 = pneg %p552_p3  ;;  %p476_p12 = scmp.lt.s32.totalorder %s467_s22, %s467_s22 }
   0xa   : > { %p427_p6 = pnand %p556_p4, %p426_p5  ;;  %p477_p13 = por %p476_p12, %p475_p11 }
   0xc   : > { %p469_p8 = pneg %p427_p6 }
   0xe   : > { %p470_p9 = pnand %p469_p8, %p468_p7 }
  0x10   : > { %p471_p10 = pneg %p470_p9 }
  0x12   : > { %p478_p0 = pnand %p477_p13, %p471_p10 }
  0x14   : > { %481 = shalt.err (!%p478_p0)
}
  0x15   : > { %s510_s23 = smov [#allocation2]   ;;  %183 = sbr.rel (%p552_p3) target bundleno = 90 (0x5a), region = 32 }
  0x16   : > { %429 = dma.vmem_to_smem (!%p427_p6), %s150_s21, 16, %s510_s23, [#allocation3]  }
  0x1a   : > { %495 = dma.done.wait (%p556_p4), [#allocation3], 16  }
  0x1b   : > { %497 = vsyncadd (%p556_p4), [#allocation3], 4294967280 }
  0x1c   : > { %189 = sfence }
  0x1d   : > { %p220_p1 = scmp.lt.s32.totalorder %s500_s12, 1  ;;  %vm247_vm0 = vcmask 1041408   ;;  %s279_s5 = sld [smem:[#allocation2]] }
  0x1e   : > { %s416_s6 = sld [smem:[#allocation2 + $0x1]] }
  0x1f   : > { %s620_s12 = smov (!%p220_p1, %s500_s12), 1  ;;  %s417_s7 = sld [smem:[#allocation2 + $0x2]] }
  0x20   : > { %s421_s24 = sshll.u32 %s620_s12, 3  ;;  %s414_s28 = sshll.u32 %s620_s12, 1 }
  0x21   : > { %s227_s27 = scalar_lea.vmem %s610_s1, %s421_s24  ;;  %s234_s4 = scalar_lea.vmem %s611_s2, %s414_s28 }
  0x22   : > { %v242_v0 = vld [vmem:[%s227_s27] sm:$0x3]  ;;  %v243_v1 = vld [vmem:[%s227_s27 + $0x2] sm:$0x3]  ;;  %v244_v2 = vld [vmem:[%s227_s27 + $0x4] sm:$0x3]  ;;  %s241_s11 = scalar_lea.vmem %s612_s3, %s414_s28 }
  0x23   : > { %v245_v3 = vld [vmem:[%s227_s27 + $0x6] sm:$0x3]  ;;  %v248_v4 = vsel %vm247_vm0, %v242_v0, -inf  ;;  %v249_v5 = vsel %vm247_vm0, %v243_v1, -inf  ;;  %v250_v6 = vsel %vm247_vm0, %v244_v2, -inf  ;;  %v280_v31 = vstv %s279_s5  ;;  %s418_s8 = sld [smem:[#allocation2 + $0x3]] }
  0x24   : > { %v251_v7 = vsel %vm247_vm0, %v245_v3, -inf  ;;  %v252_v8 = vmax.f32 %v248_v4, %v249_v5  ;;  %v246_v30 = vld [vmem:[%s234_s4] sm:$0x3]  ;;  %v285_v34 = vstv %s416_s6 }
  0x25   : > { %v253_v9 = vmax.f32 %v250_v6, %v251_v7  ;;  %vm277_vm1 = vcmp.eq.s32.totalorder %v246_v30, 0  ;;  %vm282_vm2 = vcmp.eq.s32.totalorder %v246_v30, 1  ;;  %vm287_vm3 = vcmp.eq.s32.totalorder %v246_v30, 2 }
  0x26   : > { %v278_v32 = vsel %vm277_vm1, %v242_v0, 0.0  ;;  %v281_v33 = vsel %vm277_vm1, %v280_v31, 0.0  ;;  %v290_v37 = vstv %s417_s7  ;;  %vm292_vm4 = vcmp.eq.s32.totalorder %v246_v30, 3 }
  0x27   : > { %v254_v10 = vmax.f32 %v252_v8, %v253_v9  ;;  %v283_v35 = vsel %vm282_vm2, %v243_v1, %v278_v32  ;;  %v286_v36 = vsel %vm282_vm2, %v285_v34, %v281_v33 }
  0x28   : > { %v288_v38 = vsel %vm287_vm3, %v244_v2, %v283_v35  ;;  %v291_v41 = vsel %vm287_vm3, %v290_v37, %v286_v36 }
  0x29   : > { %v255_v11 = vsub.f32 %v242_v0, %v254_v10  ;;  %v256_v12 = vsub.f32 %v243_v1, %v254_v10  ;;  %v257_v13 = vsub.f32 %v244_v2, %v254_v10  ;;  %v258_v14 = vsub.f32 %v245_v3, %v254_v10 }
  0x2a   : > { %v295_v42 = vstv %s418_s8  ;;  %v293_v43 = vsel %vm292_vm4, %v245_v3, %v288_v38 }
  0x2b   : > { %v259_v15 = vmul.f32 1.442695, %v255_v11  ;;  %v261_v16 = vmul.f32 1.442695, %v256_v12  ;;  %v263_v17 = vmul.f32 1.442695, %v257_v13  ;;  %v296_v45 = vsel %vm292_vm4, %v295_v42, %v291_v41 }
  0x2c   : > { %v265_v18 = vmul.f32 1.442695, %v258_v14 }
  0x2d   : > { %457 = vpow2.f32 %v259_v15 }
  0x2e   : > { %459 = vpow2.f32 %v261_v16 }
  0x2f   : > { %461 = vpow2.f32 %v263_v17 }
  0x30   : > { %463 = vpow2.f32 %v265_v18 }
  0x3a   : > { %v458_v19 = vpop.eup %457 }
  0x3b   : > { %v460_v20 = vpop.eup %459  ;;  %v267_v21 = vsel %vm247_vm0, %v458_v19, 0.0 }
  0x3c   : > { %v462_v22 = vpop.eup %461  ;;  %v268_v23 = vsel %vm247_vm0, %v460_v20, 0.0 }
  0x3d   : > { %v464_v24 = vpop.eup %463  ;;  %v269_v25 = vadd.f32 %v268_v23, %v267_v21  ;;  %v270_v26 = vsel %vm247_vm0, %v462_v22, 0.0 }
  0x3e   : > { %v272_v27 = vsel %vm247_vm0, %v464_v24, 0.0 }
  0x3f   : > { %v271_v28 = vadd.f32 %v270_v26, %v269_v25 }
  0x41   : > { %v273_v29 = vadd.f32 %v272_v27, %v271_v28 }
  0x43   : > { %465 = vlog2.f32 %v273_v29 }
  0x50   : > { %v466_v39 = vpop.eup %465 }
  0x51   : > { %v275_v40 = vmul.f32 0.6931472, %v466_v39 }
  0x53   : > { %v276_v44 = vadd.f32 %v275_v40, %v254_v10 }
  0x55   : > { %v297_v46 = vsub.f32 %v276_v44, %v293_v43 }
  0x57   : > { %v298_v47 = vmul.f32 %v297_v46, %v296_v45 }
  0x59   : > { %299 = vst [vmem:[%s241_s11] sm:$0x3] %v298_v47 }
  0x5a PF: > { %s14_s14 = sadd.s32 1, %s508_s14   ;;  %s615_s12 = smov %s504_s13 }
  0x5b   : > { %p11_p2 = scmp.ge.s32.totalorder %s14_s14, 4   ;;  %s616_s13 = smov %s618_s16 }
  0x5d   :  { %13 = sbr.rel (!%p11_p2) target bundleno = 2 (0x2), region = 70 }
  0x62   :  { %325 = vsyncpa [#allocation3], 1 }
  0x63   :  { %327 = vsyncpa [#allocation3 + $0x1], 1 }

</bundles_post_ra>
